<compile_context>
chip_gen: v7x
topology: tpu7x:2x2x1
jax: 0.10.0
libtpu: 0.0.40
codegen_flags: <defaults>
</compile_context>

<pallas_src>
import functools

import numpy as np
import jax
import jax.numpy as jnp
from jax.experimental import pallas as pl
from jax.experimental.pallas import tpu as pltpu


# Conservative VMEM budgeting: v7x has 64 MiB physical VMEM per TensorCore
# (v5e/v6e have 128 MiB).  Keep one grid step's working set well below that and
# state the scoped limit explicitly instead of relying on per-chip defaults.
_TILE_VMEM_BUDGET_BYTES = 40 * 1024 * 1024   # used to choose the batch tile
_VMEM_LIMIT_BYTES = 48 * 1024 * 1024         # explicit scoped-VMEM limit


def _choose_batch_tile(batch, classes, in_itemsize, override=None):
    """Largest batch tile whose double-buffered inputs + f32 temporaries fit VMEM."""
    # Per grid step: 2 inputs x 2 pipeline buffers x (TB, C) in the input dtype,
    # plus ~5 live f32 (TB, C) temporaries in the compute body.
    bytes_per_row = classes * (4 * in_itemsize + 5 * 4)
    tb = int(_TILE_VMEM_BUDGET_BYTES // bytes_per_row)
    if override is not None:
        tb = min(tb, int(override))
    tb = min(tb, 1024)          # >=512-row tiles already reach ~85% of HBM roofline
    if tb >= batch:
        return batch            # one tile spanning the full batch (always layout-legal)
    tb = (tb // 8) * 8          # sublane-aligned tiles otherwise
    if tb < 8:
        # TODO(synk): class-axis (C) tiling with an online softmax for vocab-sized C.
        raise NotImplementedError(
            "num_classes too large for a full-row VMEM tile; class-axis tiling "
            "with an online softmax is not implemented")
    return tb


def _soft_target_kernel(s_ref, t_ref, o_ref, *, temperature, batch, tile_b):
    """Partial (per batch-tile) SoftTarget loss for one (student, teacher) pair.

    s_ref, t_ref : (1, TB, C) logit tiles (any float dtype; upcast to f32 here).
    o_ref        : (1, 1, 1) f32 partial loss for this (pair, batch-tile).
    """
    inv_temp = 1.0 / temperature
    s = s_ref[0].astype(jnp.float32) * inv_temp            # (TB, C)
    t = t_ref[0].astype(jnp.float32) * inv_temp            # (TB, C)

    # student log-softmax statistics (numerically stable)
    s_max = jnp.max(s, axis=-1, keepdims=True)
    s_shift = s - s_max
    s_lse = jnp.log(jnp.sum(jnp.exp(s_shift), axis=-1, keepdims=True))    # (TB, 1)

    # teacher softmax statistics
    t_max = jnp.max(t, axis=-1, keepdims=True)
    t_shift = t - t_max
    t_exp = jnp.exp(t_shift)
    t_sum = jnp.sum(t_exp, axis=-1, keepdims=True)                        # (TB, 1)
    log_t_sum = jnp.log(t_sum)                                            # (TB, 1)

    # KL(p_t || p_s) per row WITHOUT any (TB, C) division:
    #   sum_c p_t * (log p_t - log p_s)
    #     = [sum_c t_exp * (t_shift - s_shift)] / t_sum - (log_t_sum - s_lse)
    num = jnp.sum(t_exp * (t_shift - s_shift), axis=-1, keepdims=True)    # (TB, 1)
    # B EUP reciprocals instead of B*C VPU divides; two Newton steps restore
    # full f32 accuracy at negligible (TB, 1) cost.
    inv = pl.reciprocal(t_sum, approx=True)
    inv = inv * (2.0 - t_sum * inv)
    inv = inv * (2.0 - t_sum * inv)
    per_row = num * inv - (log_t_sum - s_lse)                             # (TB, 1)

    # Mask padded rows of a remainder batch tile (static no-op when B % TB == 0).
    if batch % tile_b != 0:
        b = pl.program_id(1)
        row = b * tile_b + jax.lax.broadcasted_iota(jnp.int32, (tile_b, 1), 0)
        per_row = jnp.where(row < batch, per_row, 0.0)

    scale = (temperature * temperature) / float(batch)     # batchmean * T^2
    total = jnp.sum(per_row, axis=0, keepdims=True) * scale               # (1, 1)
    o_ref[0] = total


def soft_target_pairwise_loss_pallas(logits_s, logits_t, temperature=1.0,
                                     batch_tile=None):
    """All-pairs SoftTarget losses in a single pallas_call.

    logits_s : (num_s, B, C) student logits (f32 or bf16)
    logits_t : (num_t, B, C) teacher logits (teacher implicitly detached:
               this is a forward-only kernel)
    returns  : (num_s, num_t) f32 loss matrix
    """
    assert logits_s.ndim == 3 and logits_t.ndim == 3
    num_s, B, C = logits_s.shape
    num_t, B2, C2 = logits_t.shape
    assert (B, C) == (B2, C2), "student/teacher logits must share (batch, classes)"

    itemsize = max(jnp.dtype(logits_s.dtype).itemsize,
                   jnp.dtype(logits_t.dtype).itemsize)
    tb = _choose_batch_tile(B, C, itemsize, override=batch_tile)
    num_bt = pl.cdiv(B, tb)

    kernel = functools.partial(
        _soft_target_kernel,
        temperature=float(temperature), batch=B, tile_b=tb)

    # grid = (students, batch tiles, teachers): teachers innermost so the student
    # tile is reused (same block index -> no re-DMA) across the inner loop.
    grid = (num_s, num_bt, num_t)

    # One scalar partial per grid step, stored flat at index
    # i*(num_t*num_bt) + j*num_bt + b.  Trailing (1, 1) dims keep the output
    # block equal to the array's last two dims (layout-legal), and since every
    # grid step owns a distinct block all grid axes can be "parallel" (megacore).
    partials = pl.pallas_call(
        kernel,
        out_shape=jax.ShapeDtypeStruct((num_s * num_t * num_bt, 1, 1), jnp.float32),
        grid=grid,
        in_specs=[
            pl.BlockSpec((1, tb, C), lambda i, b, j: (i, b, 0)),
            pl.BlockSpec((1, tb, C), lambda i, b, j: (j, b, 0)),
        ],
        out_specs=pl.BlockSpec(
            (1, 1, 1),
            lambda i, b, j: (i * (num_t * num_bt) + j * num_bt + b, 0, 0)),
        compiler_params=pltpu.CompilerParams(
            dimension_semantics=("parallel", "parallel", "parallel"),
            vmem_limit_bytes=_VMEM_LIMIT_BYTES),
    )(logits_s, logits_t)

    # Tiny host-graph reduction over the batch tiles.
    return jnp.sum(partials.reshape(num_s, num_t, num_bt), axis=-1)


# ----------------------------- module-level glue -----------------------------
def _wrap1d(out):
    if not isinstance(out, (tuple, list)):
        return (out,)
    return tuple(out)


class SoftTarget:
    """JAX/Pallas port of the PyTorch SoftTarget distiller
    (single_direction=True, intra=False, exclude_self=False)."""

    def __init__(self, temperature: float = 4.0):
        self.temperature = float(temperature)
        self.single_direction = True
        self.intra = False
        self.exclude_self = False

    def __call__(self, out_s, out_t, weight_s=None):
        out_s = _wrap1d(out_s)
        out_t = _wrap1d(out_t)
        num_s, num_t = len(out_s), len(out_t)

        # directed_loss: pairwise (num_s, num_t) loss matrix, fused in ONE kernel.
        s_idx = [i for i, x in enumerate(out_s) if x is not None]
        t_idx = [j for j, x in enumerate(out_t) if x is not None]
        loss_s = jnp.zeros((num_s, num_t), jnp.float32)
        if s_idx and t_idx:
            s_stack = jnp.stack([out_s[i] for i in s_idx])
            t_stack = jnp.stack([out_t[j] for j in t_idx])
            sub = soft_target_pairwise_loss_pallas(s_stack, t_stack,
                                                   self.temperature)
            if len(s_idx) == num_s and len(t_idx) == num_t:
                loss_s = sub
            else:
                loss_s = loss_s.at[np.ix_(s_idx, t_idx)].set(sub)

        # loss_mt2vec(loss_s, weight_s, exclude_self=False)
        num_preachers = loss_s.shape[-1]
        if weight_s is None:
            loss_vec = jnp.sum(loss_s, axis=-1) / num_preachers
        else:
            w = jnp.asarray(weight_s)
            loss_vec = jnp.sum(loss_s * w, axis=-1) / num_preachers

        # single_direction -> loss_mt2vec(None) is None
        return loss_vec, None


# ------------------------------ pure-JAX reference ----------------------------
def _soft_target_loss_ref(logit_s, logit_t, temperature):
    logit_s = logit_s.astype(jnp.float32)
    logit_t = logit_t.astype(jnp.float32)
    log_p_s = jax.nn.log_softmax(logit_s / temperature, axis=-1)
    p_t = jax.nn.softmax(logit_t / temperature, axis=-1)
    log_p_t = jax.nn.log_softmax(logit_t / temperature, axis=-1)
    kld = jnp.sum(p_t * (log_p_t - log_p_s)) / logit_s.shape[0]
    return kld * temperature * temperature


if __name__ == "__main__":
    key = jax.random.PRNGKey(0)
    k1, k2, k3, k4 = jax.random.split(key, 4)
    T = 4.0
    module = SoftTarget(temperature=T)

    # --- case 1: single student / single teacher, f32, (8, 128) logits ----------
    B, C = 8, 128
    logit_s = jax.random.normal(k1, (B, C), dtype=jnp.float32)
    logit_t = jax.random.normal(k2, (B, C), dtype=jnp.float32)
    loss_vec, loss_t = module(logit_s, logit_t)
    loss_vec = jax.block_until_ready(loss_vec)
    ref = _soft_target_loss_ref(logit_s, logit_t, T)
    assert loss_t is None
    assert loss_vec.shape == (1,)
    assert jnp.allclose(loss_vec[0], ref, rtol=1e-4, atol=1e-5), (loss_vec[0], ref)

    # --- case 2: fused multi-pair grid, forced multi-tile batch with remainder ---
    B2, C2, num_s, num_t = 20, 256, 2, 3
    ss = jax.random.normal(k3, (num_s, B2, C2), dtype=jnp.float32)
    tt = jax.random.normal(k4, (num_t, B2, C2), dtype=jnp.float32)
    mat = soft_target_pairwise_loss_pallas(ss, tt, T, batch_tile=8)  # 3 tiles, 4 padded rows
    mat = jax.block_until_ready(mat)
    ref_mat = jnp.stack([
        jnp.stack([_soft_target_loss_ref(ss[i], tt[j], T) for j in range(num_t)])
        for i in range(num_s)])
    assert mat.shape == (num_s, num_t)
    assert jnp.allclose(mat, ref_mat, rtol=1e-4, atol=1e-5), (mat, ref_mat)

    # module path with lists + teacher weights
    lv, lt_none = module([ss[0], ss[1]], [tt[0], tt[1], tt[2]],
                         weight_s=jnp.ones((num_t,), jnp.float32))
    lv = jax.block_until_ready(lv)
    assert lt_none is None
    assert jnp.allclose(lv, jnp.mean(ref_mat, axis=-1), rtol=1e-4, atol=1e-5)

    # --- case 3: bf16 logits (half the HBM traffic), f32 math in-kernel ----------
    ls16 = logit_s.astype(jnp.bfloat16)
    lt16 = logit_t.astype(jnp.bfloat16)
    loss_bf16 = soft_target_pairwise_loss_pallas(ls16[None], lt16[None], T)[0, 0]
    loss_bf16 = jax.block_until_ready(loss_bf16)
    ref_bf16 = _soft_target_loss_ref(ls16, lt16, T)
    assert jnp.allclose(loss_bf16, ref_bf16, rtol=1e-4, atol=1e-5), (loss_bf16, ref_bf16)

    print("KERNEL_OK")
</pallas_src>

<mosaic_0001>
module attributes {stable_mosaic.version = 11 : i64} {
  func.func @_soft_target_kernel(%arg0: i32, %arg1: i32, %arg2: i32, %arg3: memref<1x8x128xf32, #tpu.memory_space<vmem>>, %arg4: memref<1x8x128xf32, #tpu.memory_space<vmem>>, %arg5: memref<1x1x1xf32, #tpu.memory_space<vmem>>) attributes {dimension_semantics = [#tpu.dimension_semantics<parallel>, #tpu.dimension_semantics<parallel>, #tpu.dimension_semantics<parallel>], iteration_bounds = array<i64: 1, 1, 1>, scalar_prefetch = 0 : i64, scratch_operands = 0 : i64, tpu.core_type = #tpu.core_type<tc>, window_params = [{transform_indices = @transform_0, window_bounds = array<i64: 1, 8, 128>}, {transform_indices = @transform_1, window_bounds = array<i64: 1, 8, 128>}, {transform_indices = @transform_2, window_bounds = array<i64: 1, 1, 1>}]} {
    %c0 = arith.constant 0 : index
    %c0_0 = arith.constant 0 : index
    %c0_1 = arith.constant 0 : index
    %0 = vector.load %arg3[%c0, %c0_0, %c0_1] : memref<1x8x128xf32, #tpu.memory_space<vmem>>, vector<1x8x128xf32>
    %1 = vector.shape_cast %0 : vector<1x8x128xf32> to vector<8x128xf32>
    %cst = arith.constant 2.500000e-01 : f32
    %2 = vector.broadcast %cst : f32 to vector<8x128xf32>
    %3 = arith.mulf %1, %2 : vector<8x128xf32>
    %c0_2 = arith.constant 0 : index
    %c0_3 = arith.constant 0 : index
    %c0_4 = arith.constant 0 : index
    %4 = vector.load %arg4[%c0_2, %c0_3, %c0_4] : memref<1x8x128xf32, #tpu.memory_space<vmem>>, vector<1x8x128xf32>
    %5 = vector.shape_cast %4 : vector<1x8x128xf32> to vector<8x128xf32>
    %cst_5 = arith.constant 2.500000e-01 : f32
    %6 = vector.broadcast %cst_5 : f32 to vector<8x128xf32>
    %7 = arith.mulf %5, %6 : vector<8x128xf32>
    %cst_6 = arith.constant dense<0xFF800000> : vector<8xf32>
    %8 = vector.multi_reduction <maximumf>, %3, %cst_6 [1] : vector<8x128xf32> to vector<8xf32>
    %9 = vector.shape_cast %8 : vector<8xf32> to vector<8x1xf32>
    %10 = vector.broadcast %9 : vector<8x1xf32> to vector<8x128xf32>
    %11 = arith.subf %3, %10 : vector<8x128xf32>
    %12 = math.exp %11 : vector<8x128xf32>
    %cst_7 = arith.constant dense<0.000000e+00> : vector<8xf32>
    %13 = vector.multi_reduction <add>, %12, %cst_7 [1] : vector<8x128xf32> to vector<8xf32>
    %14 = vector.shape_cast %13 : vector<8xf32> to vector<8x1xf32>
    %15 = math.log %14 : vector<8x1xf32>
    %cst_8 = arith.constant dense<0xFF800000> : vector<8xf32>
    %16 = vector.multi_reduction <maximumf>, %7, %cst_8 [1] : vector<8x128xf32> to vector<8xf32>
    %17 = vector.shape_cast %16 : vector<8xf32> to vector<8x1xf32>
    %18 = vector.broadcast %17 : vector<8x1xf32> to vector<8x128xf32>
    %19 = arith.subf %7, %18 : vector<8x128xf32>
    %20 = math.exp %19 : vector<8x128xf32>
    %cst_9 = arith.constant dense<0.000000e+00> : vector<8xf32>
    %21 = vector.multi_reduction <add>, %20, %cst_9 [1] : vector<8x128xf32> to vector<8xf32>
    %22 = vector.shape_cast %21 : vector<8xf32> to vector<8x1xf32>
    %23 = math.log %22 : vector<8x1xf32>
    %24 = arith.subf %19, %11 : vector<8x128xf32>
    %25 = arith.mulf %20, %24 : vector<8x128xf32>
    %cst_10 = arith.constant dense<0.000000e+00> : vector<8xf32>
    %26 = vector.multi_reduction <add>, %25, %cst_10 [1] : vector<8x128xf32> to vector<8xf32>
    %27 = vector.shape_cast %26 : vector<8xf32> to vector<8x1xf32>
    %28 = tpu.reciprocal %22 {approx = true} : vector<8x1xf32> -> vector<8x1xf32>
    %29 = arith.mulf %22, %28 : vector<8x1xf32>
    %cst_11 = arith.constant 2.000000e+00 : f32
    %30 = vector.broadcast %cst_11 : f32 to vector<8x1xf32>
    %31 = arith.subf %30, %29 : vector<8x1xf32>
    %32 = arith.mulf %28, %31 : vector<8x1xf32>
    %33 = arith.mulf %22, %32 : vector<8x1xf32>
    %cst_12 = arith.constant 2.000000e+00 : f32
    %34 = vector.broadcast %cst_12 : f32 to vector<8x1xf32>
    %35 = arith.subf %34, %33 : vector<8x1xf32>
    %36 = arith.mulf %32, %35 : vector<8x1xf32>
    %37 = arith.mulf %27, %36 : vector<8x1xf32>
    %38 = arith.subf %23, %15 : vector<8x1xf32>
    %39 = arith.subf %37, %38 : vector<8x1xf32>
    %cst_13 = arith.constant dense<0.000000e+00> : vector<1xf32>
    %40 = vector.multi_reduction <add>, %39, %cst_13 [0] : vector<8x1xf32> to vector<1xf32>
    %41 = vector.shape_cast %40 : vector<1xf32> to vector<1x1xf32>
    %cst_14 = arith.constant 2.000000e+00 : f32
    %42 = vector.broadcast %cst_14 : f32 to vector<1x1xf32>
    %43 = arith.mulf %41, %42 : vector<1x1xf32>
    %c0_15 = arith.constant 0 : index
    %c0_16 = arith.constant 0 : index
    %c0_17 = arith.constant 0 : index
    %44 = vector.load %arg5[%c0_15, %c0_16, %c0_17] : memref<1x1x1xf32, #tpu.memory_space<vmem>>, vector<1x1x1xf32>
    %45 = vector.shape_cast %44 : vector<1x1x1xf32> to vector<1x1xf32>
    %46 = vector.shape_cast %43 : vector<1x1xf32> to vector<1x1x1xf32>
    tpu.vector_store %arg5[%c0_15, %c0_16, %c0_17], %46 {strides = array<i32>} : memref<1x1x1xf32, #tpu.memory_space<vmem>>, vector<1x1x1xf32>,
    return
  }
  func.func @transform_0(%arg0: i32, %arg1: i32, %arg2: i32) -> (i32, i32, i32) {
    %c0_i32 = arith.constant 0 : i32
    %c0_i32_0 = arith.constant 0 : i32
    return %arg0, %arg1, %c0_i32 : i32, i32, i32
  }
  func.func @transform_1(%arg0: i32, %arg1: i32, %arg2: i32) -> (i32, i32, i32) {
    %c0_i32 = arith.constant 0 : i32
    %c0_i32_0 = arith.constant 0 : i32
    return %arg2, %arg1, %c0_i32 : i32, i32, i32
  }
  func.func @transform_2(%arg0: i32, %arg1: i32, %arg2: i32) -> (i32, i32, i32) {
    %c1_i32 = arith.constant 1 : i32
    %0 = arith.muli %arg0, %c1_i32 : i32
    %c1_i32_0 = arith.constant 1 : i32
    %1 = arith.muli %arg2, %c1_i32_0 : i32
    %2 = arith.addi %0, %1 : i32
    %3 = arith.addi %2, %arg1 : i32
    %c0_i32 = arith.constant 0 : i32
    %c0_i32_1 = arith.constant 0 : i32
    %c0_i32_2 = arith.constant 0 : i32
    return %3, %c0_i32, %c0_i32_1 : i32, i32, i32
  }
}

</mosaic_0001>

<bundles_post_ra>
// kernel: tpu_custom_call.1
= control target key start
LH: loop header
LB: loop body
LE: loop exit
PB: predicated region body
PF: predicated region fallthrough
CT: control target
= control target key end

     0   :  { %7 = vsyncpa [#allocation3], 0  ;;  %s242_s0 = inlined_call_operand.hbm [shape: f32[1,8,128], index: 0, kind: input, shape index: {}]   ;;  %s243_s1 = inlined_call_operand.hbm [shape: f32[1,8,128], index: 1, kind: input, shape index: {}]   ;;  %s244_s2 = inlined_call_operand.hbm [shape: f32[1,1,1], index: 2, kind: output, shape index: {}]  }
   0x1   :  { %8 = vsyncpa [#allocation6], 0 }
   0x2   :  { %9 = vsyncpa [#allocation4], 0  ;;  %s188_s9 = smov [#allocation2]   ;;  %s189_s11 = smov [#allocation5]  }
   0x3   :  { %s16_s10 = sshll.u32 %s188_s9, 4  ;;  %s26_s12 = sshll.u32 %s189_s11, 4  ;;  %s17_s10 = int_to_ptr.vmem [resolvable:$true] %s16_s10  ;;  %s27_s12 = int_to_ptr.vmem [resolvable:$true] %s26_s12 }
   0x4   :  { %s116_s15 = scalar_lea.hbm %s242_s0, 128 }
   0x5   :  { %p117_p0 = scmp.ne.s32.totalorder %s242_s0, %s116_s15  ;;  %p120_p1 = scmp.lt.u32.totalorder %s116_s15, %s242_s0 }
   0x7   :  { %p122_p2 = pnand %p120_p1, %p117_p0 }
   0x9   :  { %125 = shalt.err (!%p122_p2)
}
   0xa   :  { %s126_s20 = scalar_lea.vmem %s17_s10, 128  ;;  %p131_p4 = scmp.lt.s32.totalorder %s17_s10, %s17_s10 }
   0xb   :  { %p127_p3 = scmp.ne.s32.totalorder %s17_s10, %s126_s20  ;;  %p132_p5 = scmp.lt.s32.totalorder %s126_s20, %s126_s20 }
   0xd   :  { %p133_p6 = por %p132_p5, %p131_p4 }
   0xf   :  { %p134_p7 = pnand %p133_p6, %p127_p3 }
  0x11   :  { %137 = shalt.err (!%p134_p7)
}
  0x12   :  { %19 = dma.hbm_to_vmem [thread:$0]  %s242_s0, 128, %s17_s10, [#allocation3]  }
  0x13   :  { %s138_s25 = scalar_lea.hbm %s243_s1, 128 }
  0x14   :  { %p139_p8 = scmp.ne.s32.totalorder %s243_s1, %s138_s25  ;;  %p142_p9 = scmp.lt.u32.totalorder %s138_s25, %s243_s1 }
  0x16   :  { %p144_p10 = pnand %p142_p9, %p139_p8 }
  0x18   :  { %147 = shalt.err (!%p144_p10)
}
  0x19   :  { %s148_s30 = scalar_lea.vmem %s27_s12, 128  ;;  %p153_p12 = scmp.lt.s32.totalorder %s27_s12, %s27_s12 }
  0x1a   :  { %p149_p11 = scmp.ne.s32.totalorder %s27_s12, %s148_s30  ;;  %p154_p13 = scmp.lt.s32.totalorder %s148_s30, %s148_s30 }
  0x1c   :  { %p155_p0 = por %p154_p13, %p153_p12 }
  0x1e   :  { %p156_p1 = pnand %p155_p0, %p149_p11 }
  0x20   :  { %159 = shalt.err (!%p156_p1)
}
  0x21   :  { %29 = dma.hbm_to_vmem [thread:$0]  %s243_s1, 128, %s27_s12, [#allocation6]  }
  0x22   :  { %182 = dma.done.wait [#allocation3], 128  }
  0x23   :  { %183 = vsyncadd [#allocation3], 4294967168 }
  0x24   :  { %184 = dma.done.wait [#allocation6], 128  }
  0x25   :  { %185 = vsyncadd [#allocation6], 4294967168  ;;  %v40_v0 = vld [vmem:[#allocation5] sm:$0xff]  ;;  %v38_v1 = vld [vmem:[#allocation2] sm:$0xff]  ;;  %s190_s1 = smov [#allocation7]   ;;  %vm81_vm0 = vcmask 0  }
  0x26   :  { %v41_v2 = vmul.f32 0.25, %v40_v0  ;;  %v39_v3 = vmul.f32 0.25, %v38_v1  ;;  %s93_s4 = sshll.u32 %s190_s1, 4  ;;  %s94_s4 = int_to_ptr.vmem [resolvable:$true] %s93_s4 }
  0x27   :  { %s160_s5 = scalar_lea.vmem %s94_s4, 16  ;;  %s164_s6 = scalar_lea.vmem %s94_s4, 32 }
  0x28   :  { %51 = vmax.xlane.f32.xlu0 %v41_v2  ;;  %p161_p2 = scmp.ne.s32.totalorder %s94_s4, %s160_s5  ;;  %p165_p3 = scmp.lt.s32.totalorder %s94_s4, %s94_s4 }
  0x29   :  { %p166_p4 = scmp.lt.s32.totalorder %s164_s6, %s160_s5 }
  0x2b   :  { %p167_p5 = por %p166_p4, %p165_p3 }
  0x2c   :  { %42 = vmax.xlane.f32.xlu0 %v39_v3 }
  0x2d   :  { %p168_p6 = pnand %p167_p5, %p161_p2 }
  0xb5   :  { %v52_v4 = vpop.xlane.xlu0 %51 }
  0xb6   :  { %v53_v5 = vsub.f32 %v41_v2, %v52_v4 }
  0xb8   :  { %v54_v6 = vmul.f32 1.442695, %v53_v5 }
  0xb9   :  { %v43_v7 = vpop.xlane.xlu0 %42 }
  0xba   :  { %106 = vpow2.f32 %v54_v6  ;;  %v44_v8 = vsub.f32 %v39_v3, %v43_v7 }
  0xbc   :  { %v45_v9 = vmul.f32 1.442695, %v44_v8  ;;  %v60_v10 = vsub.f32 %v53_v5, %v44_v8 }
  0xbe   :  { %108 = vpow2.f32 %v45_v9 }
  0xc4   :  { %v107_v11 = vpop.eup %106 }
  0xc5   :  { %56 = vadd.xlane.f32.xlu1 %v107_v11  ;;  %v61_v12 = vmul.f32 %v107_v11, %v60_v10 }
  0xc7   :  { %62 = vadd.xlane.f32.xlu0 %v61_v12 }
  0xc8   :  { %v109_v13 = vpop.eup %108 }
  0xc9   :  { %47 = vadd.xlane.f32.xlu1 %v109_v13 }
 0x152   :  { %v57_v14 = vpop.xlane.xlu1 %56 }
 0x153   :  { %110 = vrcp.f32 %v57_v14 }
 0x154   :  { %v63_v27 = vpop.xlane.xlu0 %62 }
 0x156   :  { %v48_v15 = vpop.xlane.xlu1 %47 }
 0x157   :  { %112 = vlog2.f32 %v48_v15 }
 0x158   :  { %114 = vlog2.f32 %v57_v14 }
 0x15d   :  { %v111_v16 = vpop.eup %110 }
 0x15e   :  { %v65_v17 = vmul.f32 %v111_v16, %v57_v14 }
 0x160   :  { %v66_v18 = vsub.f32 2.0, %v65_v17 }
 0x161   :  { %v113_v20 = vpop.eup %112 }
 0x162   :  { %v67_v19 = vmul.f32 %v111_v16, %v66_v18  ;;  %v115_v22 = vpop.eup %114  ;;  %v50_v24 = vmul.f32 0.6931472, %v113_v20 }
 0x163   :  { %v59_v26 = vmul.f32 0.6931472, %v115_v22 }
 0x164   :  { %v68_v21 = vmul.f32 %v67_v19, %v57_v14 }
 0x165   :  { %v72_v29 = vsub.f32 %v59_v26, %v50_v24 }
 0x166   :  { %v69_v23 = vsub.f32 2.0, %v68_v21 }
 0x168   :  { %v70_v25 = vmul.f32 %v69_v23, %v67_v19 }
 0x16a   :  { %v71_v28 = vmul.f32 %v70_v25, %v63_v27 }
 0x16c   :  { %v73_v30 = vsub.f32 %v71_v28, %v72_v29 }
 0x16e   :  { %v74_v31 = vrot.slane %v73_v30, 4 }
 0x170   :  { %v75_v32 = vadd.f32 %v74_v31, %v73_v30 }
 0x172   :  { %v76_v33 = vrot.slane %v75_v32, 2 }
 0x174   :  { %v77_v34 = vadd.f32 %v76_v33, %v75_v32 }
 0x176   :  { %v78_v35 = vrot.slane %v77_v34, 1 }
 0x178   :  { %v79_v36 = vadd.f32 %v78_v35, %v77_v34 }
 0x17a   :  { %v80_v37 = vmul.f32 2.0, %v79_v36 }
 0x17c   :  { %82 = vst.msk [vmem:[#allocation7] sm:$0x1] %vm81_vm0, %v80_v37 }
 0x17d   :  { %171 = shalt.err (!%p168_p6)
}
 0x17e   :  { %s172_s9 = scalar_lea.hbm %s244_s2, 16 }
 0x17f   :  { %p173_p7 = scmp.ne.s32.totalorder %s244_s2, %s172_s9  ;;  %p176_p8 = scmp.lt.u32.totalorder %s172_s9, %s244_s2 }
 0x181   :  { %p178_p9 = pnand %p176_p8, %p173_p7 }
 0x183   :  { %181 = shalt.err (!%p178_p9)
}
 0x184   :  { %96 = dma.vmem_to_hbm [thread:$0]  %s94_s4, 16, %s244_s2, [#allocation4]  }
 0x185   :  { %186 = dma.done.wait [#allocation4], 16  }
 0x186   :  { %187 = vsyncadd [#allocation4], 4294967280 }
 0x187   :  { %100 = vsyncpa [#allocation3], 1 }
 0x188   :  { %101 = vsyncpa [#allocation6], 1 }
 0x189   :  { %102 = vsyncpa [#allocation4], 1 }

</bundles_post_ra>
